<compile_context>
chip_gen: v6e
topology: v6e:2x2x1
jax: 0.10.0
libtpu: 0.0.40
codegen_flags: <defaults>
</compile_context>

<pallas_src>
import numpy as np
import jax
import jax.numpy as jnp
from jax.experimental import pallas as pl
from jax.experimental.pallas import tpu as pltpu

B = 2        # batch
N_OBJ = 16   # num_obj

_TAN_PI_8 = 0.4142135623730951   # tan(pi/8)


# ----------------------------- in-kernel math --------------------------------
def _atan_poly_unit(a):
    """atan(a) for a in [0, 1] (Cephes atanf reduction + polynomial, few-ulp f32)."""
    mid = a > _TAN_PI_8
    w = jnp.where(mid, np.float32(np.pi / 4), np.float32(0.0))
    # (a - 1) / (a + 1); denominator >= 1 always, so the reciprocal is safe.
    x = jnp.where(mid, (a - 1.0) * pl.reciprocal(a + 1.0, approx=False), a)
    z = x * x
    p = (((8.05374449538e-2 * z - 1.38776856032e-1) * z
          + 1.99777106478e-1) * z - 3.33329491539e-1) * z * x + x
    return w + p


def _atan2(y, x):
    """torch.atan2(y, x): min/max form -- one polynomial, quadrant fix-ups."""
    ay, ax = jnp.abs(y), jnp.abs(x)
    num = jnp.minimum(ay, ax)
    den = jnp.maximum(ay, ax)
    r = num * pl.reciprocal(jnp.where(den == 0.0, 1.0, den), approx=False)
    t = _atan_poly_unit(r)                                   # atan(min/max) in [0, pi/4]
    t = jnp.where(ay > ax, np.float32(np.pi / 2) - t, t)     # -> atan2(|y|, |x|)
    t = jnp.where(x < 0.0, np.float32(np.pi) - t, t)         # x < 0 quadrants
    return jnp.where(y < 0.0, -t, t)                         # sign of y
    # NOTE: x == -0.0 yields 0 / +-pi/2 instead of IEEE +-pi; unreachable for
    # real box deltas (the i == j diagonal is +0.0/+0.0 and matches torch: 0).


# --------------------------------- kernel ------------------------------------
def _pseudo_coord_kernel(b_ref, out_ref):
    # b_ref: [B, N, 4] = (x1, y1, x2, y2);  out_ref: [2, B, N, N] = (rho, theta).
    bb = b_ref[...]
    n = bb.shape[1]

    # Box centers with the object index on the sublane axis ("column" orientation).
    cx_col = (bb[:, :, 0:1] + bb[:, :, 2:3]) * 0.5           # [B, N, 1]
    cy_col = (bb[:, :, 1:2] + bb[:, :, 3:4]) * 0.5           # [B, N, 1]

    # Same centers with the object index on the lane axis ("row" orientation).
    # Sublane -> lane move expressed as a masked sublane reduction so it lowers
    # on every Mosaic version (no small-shape transpose / shape_cast needed).
    ii = jax.lax.broadcasted_iota(jnp.int32, (1, n, n), 1)
    jj = jax.lax.broadcasted_iota(jnp.int32, (1, n, n), 2)
    eye = ii == jj                                           # [1, N, N] bool
    cx_row = jnp.sum(jnp.where(eye, cx_col, 0.0), axis=1, keepdims=True)  # [B, 1, N]
    cy_row = jnp.sum(jnp.where(eye, cy_col, 0.0), axis=1, keepdims=True)  # [B, 1, N]

    dx = cx_col - cx_row                                     # [B, N, N]  rel_x
    dy = cy_col - cy_row                                     # [B, N, N]  rel_y

    out_ref[0] = jnp.sqrt(dx * dx + dy * dy)                 # rho
    out_ref[1] = _atan2(dx, dy)                              # theta = atan2(rel_x, rel_y)


# --------------------------------- wrapper ------------------------------------
@jax.jit
def pseudo_coord(bbox):
    """bbox: [B, N, 4] (x1, y1, x2, y2) -> pseudo coords [B, N, N, 2] (rho, theta)."""
    Bb, N, _ = bbox.shape
    fused = pl.pallas_call(
        _pseudo_coord_kernel,
        out_shape=jax.ShapeDtypeStruct((2, Bb, N, N), jnp.float32),
        in_specs=[pl.BlockSpec(memory_space=pltpu.MemorySpace.VMEM)],
        out_specs=pl.BlockSpec(memory_space=pltpu.MemorySpace.VMEM),
    )(bbox.astype(jnp.float32))
    # Single layout op to the torch output convention (replaces the old stack).
    return jnp.moveaxis(fused, 0, -1)                        # [B, N, N, 2]


# ------------------------------ pure-JAX reference ----------------------------
def pseudo_coord_ref(bbox):
    centers = (bbox[:, :, 2:] + bbox[:, :, :2]) * 0.5
    rel = centers[:, :, None, :] - centers[:, None, :, :]
    rho = jnp.sqrt(rel[..., 0] ** 2 + rel[..., 1] ** 2)
    theta = jnp.arctan2(rel[..., 0], rel[..., 1])
    return jnp.stack([rho, theta], axis=-1)


# ----------------------------------- main -------------------------------------
if __name__ == "__main__":
    key = jax.random.PRNGKey(0)
    k1, k2 = jax.random.split(key)
    xy1 = jax.random.uniform(k1, (B, N_OBJ, 2), minval=0.0, maxval=0.5)
    wh = jax.random.uniform(k2, (B, N_OBJ, 2), minval=0.1, maxval=0.5)
    bbox = jnp.concatenate([xy1, xy1 + wh], axis=-1)         # [B, N, 4]

    out = jax.block_until_ready(pseudo_coord(bbox))
    ref = pseudo_coord_ref(bbox)

    assert out.shape == (B, N_OBJ, N_OBJ, 2)
    assert bool(jnp.all(jnp.isfinite(out)))
    assert bool(jnp.allclose(out, ref, atol=1e-5, rtol=1e-5))
    print("KERNEL_OK")
</pallas_src>

<mosaic_0001>
module attributes {stable_mosaic.version = 11 : i64} {
  func.func @_pseudo_coord_kernel(%arg0: memref<2x16x4xf32, #tpu.memory_space<vmem>>, %arg1: memref<2x2x16x16xf32, #tpu.memory_space<vmem>>) attributes {dimension_semantics = [], scalar_prefetch = 0 : i64, scratch_operands = 0 : i64, tpu.core_type = #tpu.core_type<tc>} {
    %c0 = arith.constant 0 : index
    %c0_0 = arith.constant 0 : index
    %c0_1 = arith.constant 0 : index
    %0 = vector.load %arg0[%c0, %c0_0, %c0_1] : memref<2x16x4xf32, #tpu.memory_space<vmem>>, vector<2x16x4xf32>
    %1 = vector.extract_strided_slice %0 {offsets = [0, 0, 0], sizes = [2, 16, 1], strides = [1, 1, 1]} : vector<2x16x4xf32> to vector<2x16x1xf32>
    %2 = vector.extract_strided_slice %0 {offsets = [0, 0, 2], sizes = [2, 16, 1], strides = [1, 1, 1]} : vector<2x16x4xf32> to vector<2x16x1xf32>
    %3 = arith.addf %1, %2 : vector<2x16x1xf32>
    %cst = arith.constant 5.000000e-01 : f32
    %4 = vector.broadcast %cst : f32 to vector<2x16x1xf32>
    %5 = arith.mulf %3, %4 : vector<2x16x1xf32>
    %6 = vector.extract_strided_slice %0 {offsets = [0, 0, 1], sizes = [2, 16, 1], strides = [1, 1, 1]} : vector<2x16x4xf32> to vector<2x16x1xf32>
    %7 = vector.extract_strided_slice %0 {offsets = [0, 0, 3], sizes = [2, 16, 1], strides = [1, 1, 1]} : vector<2x16x4xf32> to vector<2x16x1xf32>
    %8 = arith.addf %6, %7 : vector<2x16x1xf32>
    %cst_2 = arith.constant 5.000000e-01 : f32
    %9 = vector.broadcast %cst_2 : f32 to vector<2x16x1xf32>
    %10 = arith.mulf %8, %9 : vector<2x16x1xf32>
    %11 = tpu.iota {dimensions = array<i32: 1>} : vector<1x16x16xi32>
    %12 = tpu.iota {dimensions = array<i32: 2>} : vector<1x16x16xi32>
    %13 = arith.cmpi eq, %11, %12 : vector<1x16x16xi32>
    %cst_3 = arith.constant 0.000000e+00 : f32
    %14 = vector.shape_cast %13 : vector<1x16x16xi1> to vector<1x16x16xi1>
    %15 = vector.broadcast %14 : vector<1x16x16xi1> to vector<2x16x16xi1>
    %16 = vector.shape_cast %5 : vector<2x16x1xf32> to vector<2x16x1xf32>
    %17 = vector.broadcast %16 : vector<2x16x1xf32> to vector<2x16x16xf32>
    %18 = vector.broadcast %cst_3 : f32 to vector<2x16x16xf32>
    %19 = arith.select %15, %17, %18 : vector<2x16x16xi1>, vector<2x16x16xf32>
    %cst_4 = arith.constant dense<0.000000e+00> : vector<2x16xf32>
    %20 = vector.multi_reduction <add>, %19, %cst_4 [1] : vector<2x16x16xf32> to vector<2x16xf32>
    %21 = vector.shape_cast %20 : vector<2x16xf32> to vector<2x1x16xf32>
    %cst_5 = arith.constant 0.000000e+00 : f32
    %22 = vector.shape_cast %13 : vector<1x16x16xi1> to vector<1x16x16xi1>
    %23 = vector.broadcast %22 : vector<1x16x16xi1> to vector<2x16x16xi1>
    %24 = vector.shape_cast %10 : vector<2x16x1xf32> to vector<2x16x1xf32>
    %25 = vector.broadcast %24 : vector<2x16x1xf32> to vector<2x16x16xf32>
    %26 = vector.broadcast %cst_5 : f32 to vector<2x16x16xf32>
    %27 = arith.select %23, %25, %26 : vector<2x16x16xi1>, vector<2x16x16xf32>
    %cst_6 = arith.constant dense<0.000000e+00> : vector<2x16xf32>
    %28 = vector.multi_reduction <add>, %27, %cst_6 [1] : vector<2x16x16xf32> to vector<2x16xf32>
    %29 = vector.shape_cast %28 : vector<2x16xf32> to vector<2x1x16xf32>
    %30 = vector.broadcast %5 : vector<2x16x1xf32> to vector<2x16x16xf32>
    %31 = vector.broadcast %21 : vector<2x1x16xf32> to vector<2x16x16xf32>
    %32 = arith.subf %30, %31 : vector<2x16x16xf32>
    %33 = vector.broadcast %10 : vector<2x16x1xf32> to vector<2x16x16xf32>
    %34 = vector.broadcast %29 : vector<2x1x16xf32> to vector<2x16x16xf32>
    %35 = arith.subf %33, %34 : vector<2x16x16xf32>
    %36 = arith.mulf %32, %32 : vector<2x16x16xf32>
    %37 = arith.mulf %35, %35 : vector<2x16x16xf32>
    %38 = arith.addf %36, %37 : vector<2x16x16xf32>
    %39 = math.sqrt %38 : vector<2x16x16xf32>
    %c0_7 = arith.constant 0 : index
    %c0_8 = arith.constant 0 : index
    %c0_9 = arith.constant 0 : index
    %c0_10 = arith.constant 0 : index
    %40 = vector.load %arg1[%c0_7, %c0_8, %c0_9, %c0_10] : memref<2x2x16x16xf32, #tpu.memory_space<vmem>>, vector<1x2x16x16xf32>
    %41 = vector.shape_cast %40 : vector<1x2x16x16xf32> to vector<2x16x16xf32>
    %42 = vector.shape_cast %39 : vector<2x16x16xf32> to vector<1x2x16x16xf32>
    tpu.vector_store %arg1[%c0_7, %c0_8, %c0_9, %c0_10], %42 {strides = array<i32>} : memref<2x2x16x16xf32, #tpu.memory_space<vmem>>, vector<1x2x16x16xf32>,
    %43 = math.absf %32 : vector<2x16x16xf32>
    %44 = math.absf %35 : vector<2x16x16xf32>
    %45 = arith.minimumf %43, %44 : vector<2x16x16xf32>
    %46 = arith.maximumf %43, %44 : vector<2x16x16xf32>
    %cst_11 = arith.constant 0.000000e+00 : f32
    %47 = vector.broadcast %cst_11 : f32 to vector<2x16x16xf32>
    %48 = arith.cmpf oeq, %46, %47 : vector<2x16x16xf32>
    %cst_12 = arith.constant 1.000000e+00 : f32
    %49 = vector.broadcast %cst_12 : f32 to vector<2x16x16xf32>
    %50 = arith.select %48, %49, %46 : vector<2x16x16xi1>, vector<2x16x16xf32>
    %51 = tpu.reciprocal %50 : vector<2x16x16xf32> -> vector<2x16x16xf32>
    %52 = arith.mulf %45, %51 : vector<2x16x16xf32>
    %cst_13 = arith.constant 0.414213568 : f32
    %53 = vector.broadcast %cst_13 : f32 to vector<2x16x16xf32>
    %54 = arith.cmpf ogt, %52, %53 : vector<2x16x16xf32>
    %cst_14 = arith.constant 0.785398185 : f32
    %cst_15 = arith.constant 0.000000e+00 : f32
    %55 = vector.broadcast %cst_14 : f32 to vector<2x16x16xf32>
    %56 = vector.broadcast %cst_15 : f32 to vector<2x16x16xf32>
    %57 = arith.select %54, %55, %56 : vector<2x16x16xi1>, vector<2x16x16xf32>
    %cst_16 = arith.constant 1.000000e+00 : f32
    %58 = vector.broadcast %cst_16 : f32 to vector<2x16x16xf32>
    %59 = arith.subf %52, %58 : vector<2x16x16xf32>
    %cst_17 = arith.constant 1.000000e+00 : f32
    %60 = vector.broadcast %cst_17 : f32 to vector<2x16x16xf32>
    %61 = arith.addf %52, %60 : vector<2x16x16xf32>
    %62 = tpu.reciprocal %61 : vector<2x16x16xf32> -> vector<2x16x16xf32>
    %63 = arith.mulf %59, %62 : vector<2x16x16xf32>
    %64 = arith.select %54, %63, %52 : vector<2x16x16xi1>, vector<2x16x16xf32>
    %65 = arith.mulf %64, %64 : vector<2x16x16xf32>
    %cst_18 = arith.constant 0.0805374458 : f32
    %66 = vector.broadcast %cst_18 : f32 to vector<2x16x16xf32>
    %67 = arith.mulf %66, %65 : vector<2x16x16xf32>
    %cst_19 = arith.constant 0.138776854 : f32
    %68 = vector.broadcast %cst_19 : f32 to vector<2x16x16xf32>
    %69 = arith.subf %67, %68 : vector<2x16x16xf32>
    %70 = arith.mulf %69, %65 : vector<2x16x16xf32>
    %cst_20 = arith.constant 0.199777111 : f32
    %71 = vector.broadcast %cst_20 : f32 to vector<2x16x16xf32>
    %72 = arith.addf %70, %71 : vector<2x16x16xf32>
    %73 = arith.mulf %72, %65 : vector<2x16x16xf32>
    %cst_21 = arith.constant 0.333329499 : f32
    %74 = vector.broadcast %cst_21 : f32 to vector<2x16x16xf32>
    %75 = arith.subf %73, %74 : vector<2x16x16xf32>
    %76 = arith.mulf %75, %65 : vector<2x16x16xf32>
    %77 = arith.mulf %76, %64 : vector<2x16x16xf32>
    %78 = arith.addf %77, %64 : vector<2x16x16xf32>
    %79 = arith.addf %57, %78 : vector<2x16x16xf32>
    %80 = arith.cmpf ogt, %43, %44 : vector<2x16x16xf32>
    %cst_22 = arith.constant 1.57079637 : f32
    %81 = vector.broadcast %cst_22 : f32 to vector<2x16x16xf32>
    %82 = arith.subf %81, %79 : vector<2x16x16xf32>
    %83 = arith.select %80, %82, %79 : vector<2x16x16xi1>, vector<2x16x16xf32>
    %cst_23 = arith.constant 0.000000e+00 : f32
    %84 = vector.broadcast %cst_23 : f32 to vector<2x16x16xf32>
    %85 = arith.cmpf olt, %35, %84 : vector<2x16x16xf32>
    %cst_24 = arith.constant 3.14159274 : f32
    %86 = vector.broadcast %cst_24 : f32 to vector<2x16x16xf32>
    %87 = arith.subf %86, %83 : vector<2x16x16xf32>
    %88 = arith.select %85, %87, %83 : vector<2x16x16xi1>, vector<2x16x16xf32>
    %cst_25 = arith.constant 0.000000e+00 : f32
    %89 = vector.broadcast %cst_25 : f32 to vector<2x16x16xf32>
    %90 = arith.cmpf olt, %32, %89 : vector<2x16x16xf32>
    %cst_26 = arith.constant 0.000000e+00 : f32
    %91 = vector.broadcast %cst_26 : f32 to vector<2x16x16xf32>
    %92 = arith.subf %91, %88 : vector<2x16x16xf32>
    %93 = arith.select %90, %92, %88 : vector<2x16x16xi1>, vector<2x16x16xf32>
    %c1 = arith.constant 1 : index
    %c0_27 = arith.constant 0 : index
    %c0_28 = arith.constant 0 : index
    %c0_29 = arith.constant 0 : index
    %94 = vector.load %arg1[%c1, %c0_27, %c0_28, %c0_29] : memref<2x2x16x16xf32, #tpu.memory_space<vmem>>, vector<1x2x16x16xf32>
    %95 = vector.shape_cast %94 : vector<1x2x16x16xf32> to vector<2x16x16xf32>
    %96 = vector.shape_cast %93 : vector<2x16x16xf32> to vector<1x2x16x16xf32>
    tpu.vector_store %arg1[%c1, %c0_27, %c0_28, %c0_29], %96 {strides = array<i32>} : memref<2x2x16x16xf32, #tpu.memory_space<vmem>>, vector<1x2x16x16xf32>,
    return
  }
}

</mosaic_0001>

<bundles_post_ra>
// kernel: pseudo_coord.1
= control target key start
LH: loop header
LB: loop body
LE: loop exit
PB: predicated region body
PF: predicated region fallthrough
CT: control target
= control target key end

     0   :  { %v377_v2 = vmov 0   ;;  %s378_s10 = smov 126   ;;  %v379_v17 = vmov 1   ;;  %v36_v18 = vlaneseq  ;;  %vm71_vm2 = vcmask 130048   ;;  %s587_s0 = inlined_call_operand.vmem [shape: f32[2,16,4], index: 0, kind: input, shape index: {}]   ;;  %s588_s1 = inlined_call_operand.vmem [shape: f32[2,2,16,16], index: 1, kind: output, shape index: {}]  }
   0x1   :  { %v10_v0 = vld [vmem:[%s587_s0 + $0x10] sm:$0xff]  ;;  %v8_v1 = vld [vmem:[%s587_s0] sm:$0xff]  ;;  %349 = vset.pattern.permute.xlu0 %v377_v2  ;;  %350 = vset.pattern.permute.xlu1 %v377_v2  ;;  %v11_v3 = vld [vmem:[%s587_s0 + $0x18] sm:$0xff] }
   0x2   :  { %20 = vrot.lane.b32.xlu1 %v10_v0, %s378_s10  ;;  %16 = vrot.lane.b32.xlu0 %v8_v1, %s378_s10  ;;  %v9_v4 = vld [vmem:[%s587_s0 + $0x8] sm:$0xff]  ;;  %v37_v19 = vshrl.u32 %v36_v18, 7  ;;  %v40_v20 = vand.u32 127, %v36_v18 }
   0x4   :  { %v38_v21 = vadd.s32 8, %v37_v19  ;;  %vm41_vm0 = vcmp.eq.s32.totalorder %v37_v19, %v40_v20 }
   0x6   :  { %22 = vrot.lane.b32.xlu1 %v11_v3, %s378_s10  ;;  %18 = vrot.lane.b32.xlu0 %v9_v4, %s378_s10  ;;  %vm42_vm1 = vcmp.eq.s32.totalorder %v38_v21, %v40_v20 }
  0x74   :  { %v21_v5 = vpop.permute.xlu1 %20  ;;  %v17_v6 = vpop.permute.xlu0 %16 }
  0x75   :  { %v28_v7 = vadd.f32 %v17_v6, %v8_v1  ;;  %v30_v11 = vadd.f32 %v21_v5, %v10_v0 }
  0x77   :  { %v32_v8 = vmul.f32 0.5, %v28_v7  ;;  %v34_v16 = vmul.f32 0.5, %v30_v11 }
  0x78   :  { %v23_v9 = vpop.permute.xlu1 %22  ;;  %v19_v10 = vpop.permute.xlu0 %18 }
  0x79   :  { %v31_v12 = vadd.f32 %v23_v9, %v11_v3  ;;  %v29_v13 = vadd.f32 %v19_v10, %v9_v4  ;;  %49 = vperm.xlu0 %349, %v32_v8  }
  0x7b   :  { %v35_v14 = vmul.f32 0.5, %v31_v12  ;;  %v33_v15 = vmul.f32 0.5, %v29_v13 }
  0x7d   :  { %64 = vperm.xlu0 %349, %v35_v14   ;;  %54 = vperm.xlu1 %350, %v33_v15  }
  0x81   :  { %352 = vset.pattern.permute.xlu0 %v379_v17  ;;  %59 = vperm.xlu1 %350, %v34_v16  }
  0x82   :  { %95 = vperm.xlu0 %352, %v33_v15  }
  0x85   :  { %351 = vset.pattern.permute.xlu1 %v379_v17 }
  0x86   :  { %91 = vperm.xlu1 %351, %v32_v8  }
  0x8a   :  { %99 = vperm.xlu1 %351, %v34_v16  }
  0x8e   :  { %103 = vperm.xlu1 %351, %v35_v14  }
  0xf4   :  { %v50_v22 = vpop.permute.xlu0 %49 }
  0xf5   :  { %v67_v23 = vsel %vm41_vm0, %v50_v22, 0.0 }
  0xf6   :  { %v72_v27 = vsel %vm71_vm2, %v67_v23, 0.0 }
  0xf8   :  { %v55_v24 = vpop.permute.xlu1 %54  ;;  %v404_v25 = vpop.permute.xlu0 %64 }
  0xf9   :  { %v68_v26 = vsel %vm42_vm1, %v55_v24, 0.0  ;;  %v70_v30 = vsel %vm42_vm1, %v404_v25, 0.0 }
  0xfa   :  { %v73_v28 = vsel %vm71_vm2, %v68_v26, 0.0  ;;  %v82_v36 = vsel %vm71_vm2, %v70_v30, 0.0 }
  0xfb   :  { %v74_v29 = vadd.f32 %v73_v28, %v72_v27 }
  0xfc   :  { %v411_v31 = vpop.permute.xlu1 %59 }
  0xfd   :  { %v75_v32 = vrot.slane %v74_v29, 4  ;;  %v69_v33 = vsel %vm41_vm0, %v411_v31, 0.0  ;;  %v96_v34 = vpop.permute.xlu0 %95 }
  0xfe   :  { %v81_v37 = vsel %vm71_vm2, %v69_v33, 0.0  ;;  %v107_v38 = vsel %vm42_vm1, %v96_v34, 0.0 }
  0xff   :  { %v76_v35 = vadd.f32 %v75_v32, %v74_v29  ;;  %v83_v41 = vadd.f32 %v82_v36, %v81_v37  ;;  %v111_v43 = vsel %vm71_vm2, %v107_v38, 0.0 }
 0x101   :  { %v77_v39 = vrot.slane %v76_v35, 2  ;;  %v92_v40 = vpop.permute.xlu1 %91  ;;  %v84_v48 = vrot.slane %v83_v41, 4 }
 0x102   :  { %v106_v42 = vsel %vm41_vm0, %v92_v40, 0.0 }
 0x103   :  { %v110_v44 = vsel %vm71_vm2, %v106_v42, 0.0  ;;  %v78_v45 = vadd.f32 %v77_v39, %v76_v35  ;;  %v85_v53 = vadd.f32 %v84_v48, %v83_v41 }
 0x104   :  { %v112_v46 = vadd.f32 %v111_v43, %v110_v44 }
 0x105   :  { %v100_v47 = vpop.permute.xlu1 %99  ;;  %v79_v50 = vrot.slane %v78_v45, 1  ;;  %v86_v61 = vrot.slane %v85_v53, 2 }
 0x106   :  { %v113_v49 = vrot.slane %v112_v46, 4  ;;  %v108_v55 = vsel %vm41_vm0, %v100_v47, 0.0 }
 0x107   :  { %v80_v57 = vadd.f32 %v79_v50, %v78_v45  ;;  %v119_v59 = vsel %vm71_vm2, %v108_v55, 0.0  ;;  %v87_v4 = vadd.f32 %v86_v61, %v85_v53 }
 0x108   :  { %v114_v51 = vadd.f32 %v113_v49, %v112_v46 }
 0x109   :  { %v104_v52 = vpop.permute.xlu1 %103  ;;  %v425_v0 = vsub.f32 %v50_v22, %v80_v57  ;;  %v427_v1 = vsub.f32 %v55_v24, %v80_v57  ;;  %v88_v16 = vrot.slane %v87_v4, 1 }
 0x10a   :  { %v115_v54 = vrot.slane %v114_v51, 2  ;;  %v109_v56 = vsel %vm42_vm1, %v104_v52, 0.0 }
 0x10b   :  { %v120_v60 = vsel %vm71_vm2, %v109_v56, 0.0  ;;  %v137_v8 = vmul.f32 %v427_v1, %v427_v1  ;;  %v136_v9 = vmul.f32 %v425_v0, %v425_v0  ;;  %v448_v14 = vand.u32 2147483647, %v425_v0 }
 0x10c   :  { %v116_v58 = vadd.f32 %v115_v54, %v114_v51  ;;  %v121_v63 = vadd.f32 %v120_v60, %v119_v59  ;;  %v451_v15 = vand.u32 2147483647, %v427_v1  ;;  %v89_v22 = vadd.f32 %v88_v16, %v87_v4 }
 0x10e   :  { %v117_v62 = vrot.slane %v116_v58, 1  ;;  %v122_v3 = vrot.slane %v121_v63, 4  ;;  %v458_v28 = vsub.f32 %v411_v31, %v89_v22  ;;  %v461_v29 = vsub.f32 %v404_v25, %v89_v22 }
 0x110   :  { %v118_v2 = vadd.f32 %v117_v62, %v116_v58  ;;  %v123_v7 = vadd.f32 %v122_v3, %v121_v63  ;;  %v139_v35 = vmul.f32 %v461_v29, %v461_v29  ;;  %v482_v38 = vand.u32 2147483647, %v458_v28 }
 0x111   :  { %v485_v39 = vand.u32 2147483647, %v461_v29 }
 0x112   :  { %v429_v5 = vsub.f32 %v92_v40, %v118_v2  ;;  %v431_v6 = vsub.f32 %v96_v34, %v118_v2  ;;  %v124_v19 = vrot.slane %v123_v7, 2  ;;  %v138_v34 = vmul.f32 %v458_v28, %v458_v28 }
 0x114   :  { %v140_v10 = vmul.f32 %v429_v5, %v429_v5  ;;  %v141_v11 = vmul.f32 %v431_v6, %v431_v6  ;;  %v442_v12 = vand.u32 2147483647, %v429_v5  ;;  %v445_v13 = vand.u32 2147483647, %v431_v6 }
 0x115   :  { %v125_v23 = vadd.f32 %v124_v19, %v123_v7 }
 0x116   :  { %v144_v17 = vadd.f32 %v140_v10, %v136_v9  ;;  %v145_v18 = vadd.f32 %v141_v11, %v137_v8  ;;  %v192_v20 = vmax.f32 %v448_v14, %v442_v12  ;;  %v193_v21 = vmax.f32 %v451_v15, %v445_v13 }
 0x117   :  { %v126_v27 = vrot.slane %v125_v23, 1  ;;  %v188_v43 = vmin.f32 %v448_v14, %v442_v12  ;;  %v189_v44 = vmin.f32 %v451_v15, %v445_v13 }
 0x118   :  { %353 = vrsqrt.f32 %v144_v17  ;;  %vm196_vm3 = vcmp.eq.f32.partialorder %v192_v20, 0.0  ;;  %vm197_vm4 = vcmp.eq.f32.partialorder %v193_v21, 0.0  ;;  %vm150_vm5 = vcmp.eq.f32.partialorder %v144_v17, inf }
 0x119   :  { %355 = vrsqrt.f32 %v145_v18  ;;  %v200_v24 = vsel %vm196_vm3, 1.0, %v192_v20  ;;  %v201_v26 = vsel %vm197_vm4, 1.0, %v193_v21  ;;  %v127_v30 = vadd.f32 %v126_v27, %v125_v23 }
 0x11a   :  { %357 = vrcp.f32 %v200_v24  ;;  %vm152_vm6 = vcmp.eq.f32.partialorder %v144_v17, 0.0  ;;  %v153_v49 = vand.u32 2147483648, %v144_v17  ;;  %vm157_vm7 = vcmp.eq.f32.partialorder %v145_v18, inf }
 0x11b   :  { %359 = vrcp.f32 %v201_v26  ;;  %v463_v32 = vsub.f32 %v100_v47, %v127_v30  ;;  %v465_v33 = vsub.f32 %v104_v52, %v127_v30  ;;  %vm159_vm8 = vcmp.eq.f32.partialorder %v145_v18, 0.0 }
 0x11c   :  { %v160_v52 = vand.u32 2147483648, %v145_v18  ;;  %vm284_vm4 = vcmp.gt.f32.partialorder %v448_v14, %v442_v12 }
 0x11d   :  { %v142_v36 = vmul.f32 %v463_v32, %v463_v32  ;;  %v143_v31 = vmul.f32 %v465_v33, %v465_v33  ;;  %v476_v25 = vand.u32 2147483647, %v463_v32  ;;  %v479_v37 = vand.u32 2147483647, %v465_v33 }
 0x11f   :  { %v146_v40 = vadd.f32 %v142_v36, %v138_v34  ;;  %v147_v41 = vadd.f32 %v143_v31, %v139_v35  ;;  %v194_v45 = vmax.f32 %v482_v38, %v476_v25  ;;  %v195_v46 = vmax.f32 %v485_v39, %v479_v37 }
 0x120   :  { %v190_v9 = vmin.f32 %v482_v38, %v476_v25  ;;  %v191_v19 = vmin.f32 %v485_v39, %v479_v37 }
 0x121   :  { %361 = vrsqrt.f32 %v146_v40  ;;  %vm198_vm9 = vcmp.eq.f32.partialorder %v194_v45, 0.0  ;;  %vm199_vm10 = vcmp.eq.f32.partialorder %v195_v46, 0.0  ;;  %vm164_vm11 = vcmp.eq.f32.partialorder %v146_v40, inf }
 0x122   :  { %363 = vrsqrt.f32 %v147_v41  ;;  %v202_v56 = vsel %vm198_vm9, 1.0, %v194_v45  ;;  %v203_v60 = vsel %vm199_vm10, 1.0, %v195_v46  ;;  %v167_v7 = vand.u32 2147483648, %v146_v40 }
 0x123   :  { %365 = vrcp.f32 %v202_v56  ;;  %vm166_vm12 = vcmp.eq.f32.partialorder %v146_v40, 0.0  ;;  %vm171_vm13 = vcmp.eq.f32.partialorder %v147_v41, inf  ;;  %v174_v11 = vand.u32 2147483648, %v147_v41 }
 0x124   :  { %367 = vrcp.f32 %v203_v60  ;;  %vm173_vm14 = vcmp.eq.f32.partialorder %v147_v41, 0.0  ;;  %vm309_vm9 = vcmp.lt.f32.partialorder %v427_v1, 0.0  ;;  %vm286_vm10 = vcmp.gt.f32.partialorder %v482_v38, %v476_v25 }
 0x125   :  { %v354_v42 = vpop.eup %353 }
 0x126   :  { %v356_v47 = vpop.eup %355  ;;  %v149_v48 = vmul.f32 %v354_v42, %v144_v17 }
 0x127   :  { %v156_v50 = vmul.f32 %v356_v47, %v145_v18  ;;  %v358_v53 = vpop.eup %357 }
 0x128   :  { %v151_v51 = vsel %vm150_vm5, %v144_v17, %v149_v48  ;;  %v360_v57 = vpop.eup %359  ;;  %v499_v59 = vmul.f32 %v358_v53, %v188_v43  ;;  %vm285_vm5 = vcmp.gt.f32.partialorder %v451_v15, %v445_v13 }
 0x129   :  { %v154_v54 = vsel %vm152_vm6, %v153_v49, %v151_v51  ;;  %v158_v55 = vsel %vm157_vm7, %v145_v18, %v156_v50  ;;  %v505_v61 = vmul.f32 %v360_v57, %v189_v44  ;;  %vm296_vm6 = vcmp.lt.f32.partialorder %v429_v5, 0.0 }
 0x12a   :  { %v161_v58 = vsel %vm159_vm8, %v160_v52, %v158_v55  ;;  %176 = vst.msk [vmem:[%s588_s1] sm:$0xff] %vm71_vm2, %v154_v54  ;;  %v224_v62 = vadd.f32 1.0, %v499_v59  ;;  %v329_v24 = vadd.f32 -1.0, %v499_v59  ;;  %vm212_vm15 = vcmp.gt.f32.partialorder %v499_v59, 0.41421357 }
 0x12b   :  { %177 = vst.msk [vmem:[%s588_s1 + $0x8] sm:$0xff] %vm71_vm2, %v161_v58  ;;  %v225_v63 = vadd.f32 1.0, %v505_v61  ;;  %v330_v30 = vadd.f32 -1.0, %v505_v61  ;;  %vm213_vm0 = vcmp.gt.f32.partialorder %v505_v61, 0.41421357  ;;  %vm297_vm7 = vcmp.lt.f32.partialorder %v431_v6, 0.0 }
 0x12c   :  { %369 = vrcp.f32 %v224_v62  ;;  %vm308_vm8 = vcmp.lt.f32.partialorder %v425_v0, 0.0 }
 0x12d   :  { %371 = vrcp.f32 %v225_v63 }
 0x12e   :  { %v362_v2 = vpop.eup %361 }
 0x12f   :  { %v364_v3 = vpop.eup %363  ;;  %v163_v4 = vmul.f32 %v362_v2, %v146_v40 }
 0x130   :  { %v170_v8 = vmul.f32 %v364_v3, %v147_v41  ;;  %v366_v16 = vpop.eup %365 }
 0x131   :  { %v165_v10 = vsel %vm164_vm11, %v146_v40, %v163_v4  ;;  %v368_v20 = vpop.eup %367  ;;  %v517_v22 = vmul.f32 %v366_v16, %v190_v9  ;;  %vm287_vm11 = vcmp.gt.f32.partialorder %v485_v39, %v479_v37 }
 0x132   :  { %v168_v17 = vsel %vm166_vm12, %v167_v7, %v165_v10  ;;  %v172_v18 = vsel %vm171_vm13, %v147_v41, %v170_v8  ;;  %v523_v23 = vmul.f32 %v368_v20, %v191_v19  ;;  %v380_v20 = vmov 0.0  }
 0x133   :  { %v175_v21 = vsel %vm173_vm14, %v174_v11, %v172_v18  ;;  %178 = vst.msk [vmem:[%s588_s1 + $0x10] sm:$0xff] %vm71_vm2, %v168_v17  ;;  %v226_v26 = vadd.f32 1.0, %v517_v22  ;;  %v331_v52 = vadd.f32 -1.0, %v517_v22  ;;  %vm214_vm1 = vcmp.gt.f32.partialorder %v517_v22, 0.41421357 }
 0x134   :  { %179 = vst.msk [vmem:[%s588_s1 + $0x18] sm:$0xff] %vm71_vm2, %v175_v21  ;;  %v227_v34 = vadd.f32 1.0, %v523_v23  ;;  %v332_v55 = vadd.f32 -1.0, %v523_v23  ;;  %vm215_vm3 = vcmp.gt.f32.partialorder %v523_v23, 0.41421357  ;;  %vm298_vm12 = vcmp.lt.f32.partialorder %v463_v32, 0.0 }
 0x135   :  { %373 = vrcp.f32 %v226_v26  ;;  %v216_v21 = vsel %vm212_vm15, 0.7853982, %v380_v20  ;;  %v218_v0 = vsel %vm214_vm1, 0.7853982, %v380_v20  ;;  %v219_v1 = vsel %vm215_vm3, 0.7853982, %v380_v20 }
 0x136   :  { %375 = vrcp.f32 %v227_v34  ;;  %vm299_vm13 = vcmp.lt.f32.partialorder %v465_v33, 0.0  ;;  %vm310_vm14 = vcmp.lt.f32.partialorder %v458_v28, 0.0 }
 0x139   :  { %v370_v27 = vpop.eup %369 }
 0x13a   :  { %v372_v35 = vpop.eup %371  ;;  %v232_v36 = vmul.f32 %v370_v27, %v329_v24  ;;  %v217_v27 = vsel %vm213_vm0, 0.7853982, %v380_v20 }
 0x13b   :  { %v233_v31 = vmul.f32 %v372_v35, %v330_v30 }
 0x13c   :  { %v236_v40 = vsel %vm212_vm15, %v232_v36, %v499_v59  ;;  %vm311_vm15 = vcmp.lt.f32.partialorder %v461_v29, 0.0 }
 0x13d   :  { %v237_v41 = vsel %vm213_vm0, %v233_v31, %v505_v61  ;;  %v240_v42 = vmul.f32 %v236_v40, %v236_v40 }
 0x13e   :  { %v241_v43 = vmul.f32 %v237_v41, %v237_v41 }
 0x13f   :  { %v244_v44 = vmul.f32 0.080537446, %v240_v42 }
 0x140   :  { %v245_v45 = vmul.f32 0.080537446, %v241_v43 }
 0x141   :  { %v333_v46 = vadd.f32 -0.13877685, %v244_v44 }
 0x142   :  { %v334_v47 = vadd.f32 -0.13877685, %v245_v45  ;;  %v374_v53 = vpop.eup %373 }
 0x143   :  { %v252_v48 = vmul.f32 %v333_v46, %v240_v42  ;;  %v376_v56 = vpop.eup %375  ;;  %v234_v58 = vmul.f32 %v374_v53, %v331_v52 }
 0x144   :  { %v253_v49 = vmul.f32 %v334_v47, %v241_v43  ;;  %v235_v62 = vmul.f32 %v376_v56, %v332_v55 }
 0x145   :  { %v256_v50 = vadd.f32 0.19977711, %v252_v48  ;;  %v238_v2 = vsel %vm214_vm1, %v234_v58, %v517_v22 }
 0x146   :  { %v257_v51 = vadd.f32 0.19977711, %v253_v49  ;;  %v239_v4 = vsel %vm215_vm3, %v235_v62, %v523_v23  ;;  %v242_v7 = vmul.f32 %v238_v2, %v238_v2 }
 0x147   :  { %v260_v54 = vmul.f32 %v256_v50, %v240_v42  ;;  %v243_v9 = vmul.f32 %v239_v4, %v239_v4 }
 0x148   :  { %v261_v57 = vmul.f32 %v257_v51, %v241_v43  ;;  %v246_v11 = vmul.f32 0.080537446, %v242_v7 }
 0x149   :  { %v337_v60 = vadd.f32 -0.3333295, %v260_v54  ;;  %v247_v17 = vmul.f32 0.080537446, %v243_v9 }
 0x14a   :  { %v338_v63 = vadd.f32 -0.3333295, %v261_v57  ;;  %v335_v19 = vadd.f32 -0.13877685, %v246_v11 }
 0x14b   :  { %v268_v3 = vmul.f32 %v337_v60, %v240_v42  ;;  %v336_v26 = vadd.f32 -0.13877685, %v247_v17 }
 0x14c   :  { %v269_v8 = vmul.f32 %v338_v63, %v241_v43  ;;  %v254_v34 = vmul.f32 %v335_v19, %v242_v7 }
 0x14d   :  { %v272_v10 = vmul.f32 %v268_v3, %v236_v40  ;;  %v255_v36 = vmul.f32 %v336_v26, %v243_v9 }
 0x14e   :  { %v273_v16 = vmul.f32 %v269_v8, %v237_v41  ;;  %v258_v42 = vadd.f32 0.19977711, %v254_v34 }
 0x14f   :  { %v276_v18 = vadd.f32 %v272_v10, %v236_v40  ;;  %v259_v43 = vadd.f32 0.19977711, %v255_v36 }
 0x150   :  { %v277_v24 = vadd.f32 %v273_v16, %v237_v41  ;;  %v262_v41 = vmul.f32 %v258_v42, %v242_v7 }
 0x151   :  { %v280_v30 = vadd.f32 %v276_v18, %v216_v21  ;;  %v263_v61 = vmul.f32 %v259_v43, %v243_v9 }
 0x152   :  { %v281_v35 = vadd.f32 %v277_v24, %v217_v27  ;;  %v339_v47 = vadd.f32 -0.3333295, %v262_v41 }
 0x153   :  { %v288_v31 = vsub.f32 1.5707964, %v280_v30  ;;  %v340_v49 = vadd.f32 -0.3333295, %v263_v61 }
 0x154   :  { %v289_v40 = vsub.f32 1.5707964, %v281_v35  ;;  %v270_v14 = vmul.f32 %v339_v47, %v242_v7 }
 0x155   :  { %v292_v59 = vsel %vm284_vm4, %v288_v31, %v280_v30  ;;  %v271_v13 = vmul.f32 %v340_v49, %v243_v9 }
 0x156   :  { %v293_v44 = vsel %vm285_vm5, %v289_v40, %v281_v35  ;;  %v300_v45 = vsub.f32 3.1415927, %v292_v59  ;;  %v274_v52 = vmul.f32 %v270_v14, %v238_v2 }
 0x157   :  { %v301_v46 = vsub.f32 3.1415927, %v293_v44  ;;  %v275_v5 = vmul.f32 %v271_v13, %v239_v4 }
 0x158   :  { %v304_v48 = vsel %vm296_vm6, %v300_v45, %v292_v59  ;;  %v278_v6 = vadd.f32 %v274_v52, %v238_v2 }
 0x159   :  { %v305_v50 = vsel %vm297_vm7, %v301_v46, %v293_v44  ;;  %v312_v12 = vsub.f32 0.0, %v304_v48  ;;  %v279_v54 = vadd.f32 %v275_v5, %v239_v4 }
 0x15a   :  { %v313_v51 = vsub.f32 0.0, %v305_v50  ;;  %v282_v55 = vadd.f32 %v278_v6, %v218_v0 }
 0x15b   :  { %v316_v15 = vsel %vm308_vm8, %v312_v12, %v304_v48  ;;  %v283_v56 = vadd.f32 %v279_v54, %v219_v1 }
 0x15c   :  { %v317_v53 = vsel %vm309_vm9, %v313_v51, %v305_v50  ;;  %341 = vst.msk [vmem:[%s588_s1 + $0x20] sm:$0xff] %vm71_vm2, %v316_v15  ;;  %v290_v57 = vsub.f32 1.5707964, %v282_v55 }
 0x15d   :  { %342 = vst.msk [vmem:[%s588_s1 + $0x28] sm:$0xff] %vm71_vm2, %v317_v53  ;;  %v291_v58 = vsub.f32 1.5707964, %v283_v56 }
 0x15e   :  { %v294_v60 = vsel %vm286_vm10, %v290_v57, %v282_v55 }
 0x15f   :  { %v295_v62 = vsel %vm287_vm11, %v291_v58, %v283_v56  ;;  %v302_v63 = vsub.f32 3.1415927, %v294_v60 }
 0x160   :  { %v303_v22 = vsub.f32 3.1415927, %v295_v62 }
 0x161   :  { %v306_v23 = vsel %vm298_vm12, %v302_v63, %v294_v60 }
 0x162   :  { %v307_v2 = vsel %vm299_vm13, %v303_v22, %v295_v62  ;;  %v314_v3 = vsub.f32 0.0, %v306_v23 }
 0x163   :  { %v315_v4 = vsub.f32 0.0, %v307_v2 }
 0x164   :  { %v318_v25 = vsel %vm310_vm14, %v314_v3, %v306_v23 }
 0x165   :  { %v319_v38 = vsel %vm311_vm15, %v315_v4, %v307_v2  ;;  %343 = vst.msk [vmem:[%s588_s1 + $0x30] sm:$0xff] %vm71_vm2, %v318_v25 }
 0x166   :  { %344 = vst.msk [vmem:[%s588_s1 + $0x38] sm:$0xff] %vm71_vm2, %v319_v38 }

</bundles_post_ra>
